<compile_context>
chip_gen: v7x
topology: tpu7x:2x2x1
jax: 0.10.0
libtpu: 0.0.40
codegen_flags: <defaults>
</compile_context>

<pallas_src>
import functools

import jax
import jax.numpy as jnp
from jax.experimental import pallas as pl
from jax.experimental.pallas import tpu as pltpu

_EPS = 1e-5
_NEG_SLOPE = 0.01          # nn.LeakyReLU() default
_HIDDEN = [10240, 5120, 2560, 1280, 512, 256, 64]
_N_TAIL_LAYERS = 4         # 1280->512->256->64->1 fused into one call


def _bn_act(h, g, bt, use_bn, act):
    """Shared epilogue: (optional) batch-stat BN, then LeakyReLU / Sigmoid."""
    if use_bn:
        mean = jnp.mean(h, axis=0, keepdims=True)
        var = jnp.mean((h - mean) ** 2, axis=0, keepdims=True)
        h = (h - mean) * jax.lax.rsqrt(var + _EPS) * g + bt
    if act == "leaky":
        h = jnp.where(h >= 0.0, h, _NEG_SLOPE * h)
    elif act == "sigmoid":
        h = 1.0 / (1.0 + jnp.exp(-h))
    return h


# ---------------------------------------------------------------------------
# Per-layer fused Linear [+ BN] + activation (used for the big layers).
# ---------------------------------------------------------------------------
def _fused_linear_kernel(*refs, use_bn, act):
    if use_bn:
        x_ref, w_ref, b_ref, g_ref, bt_ref, o_ref = refs
    else:
        x_ref, w_ref, b_ref, o_ref = refs
        g_ref = bt_ref = None
    k = pl.program_id(1)

    @pl.when(k == 0)
    def _():
        o_ref[...] = jnp.zeros_like(o_ref)

    # bf16 x bf16 -> f32, accumulated directly into the resident output block.
    o_ref[...] += jnp.dot(x_ref[...].astype(jnp.bfloat16), w_ref[...],
                          preferred_element_type=jnp.float32)

    @pl.when(k == pl.num_programs(1) - 1)
    def _():
        h = o_ref[...] + b_ref[...]
        g = g_ref[...] if use_bn else None
        bt = bt_ref[...] if use_bn else None
        o_ref[...] = _bn_act(h, g, bt, use_bn, act)


def _pick_tile(dim, cap):
    """Largest multiple-of-128 divisor of `dim` that is <= cap (else dim)."""
    cap = min(cap, dim)
    for t in range(cap - cap % 128, 0, -128):
        if dim % t == 0:
            return t
    return dim


def fused_linear_bn_act(x, p):
    M, K = x.shape
    N = p["w"].shape[1]
    use_bn, act = p["use_bn"], p["act"]

    # Big (multi-MB) weight tiles -> few grid steps -> near-roofline DMA.
    tk = _pick_tile(K, 2560)
    # Keep >= 2 blocks along N so both v7x TensorCores stream weights.
    tn = _pick_tile(N, min(2560, max(N // 2, 128)))
    grid = (N // tn, K // tk)          # N parallel, K (reduction) trailing

    in_specs = [
        pl.BlockSpec((M, tk), lambda j, k: (0, k)),    # x
        pl.BlockSpec((tk, tn), lambda j, k: (k, j)),   # w (bf16)
        pl.BlockSpec((1, tn), lambda j, k: (0, j)),    # bias
    ]
    args = [x, p["w"], p["b"].reshape(1, N)]
    if use_bn:
        in_specs += [pl.BlockSpec((1, tn), lambda j, k: (0, j)),   # gamma
                     pl.BlockSpec((1, tn), lambda j, k: (0, j))]   # beta
        args += [p["gamma"].reshape(1, N), p["beta"].reshape(1, N)]

    cost = pl.CostEstimate(
        flops=2 * M * K * N,
        transcendentals=0,
        bytes_accessed=M * K * 4 + K * N * 2 + M * N * 4
                       + (3 if use_bn else 1) * N * 4)

    return pl.pallas_call(
        functools.partial(_fused_linear_kernel, use_bn=use_bn, act=act),
        out_shape=jax.ShapeDtypeStruct((M, N), jnp.float32),
        grid_spec=pltpu.PrefetchScalarGridSpec(
            num_scalar_prefetch=0,
            grid=grid,
            in_specs=in_specs,
            out_specs=pl.BlockSpec((M, tn), lambda j, k: (0, j)),
        ),
        compiler_params=pltpu.CompilerParams(
            dimension_semantics=("parallel", "arbitrary"),
            vmem_limit_bytes=48 * 1024 * 1024),
        cost_estimate=cost,
    )(*args)


# ---------------------------------------------------------------------------
# Fused tail: 1280 -> 512 -> 256 -> 64 -> 1 in a single pallas_call,
# all weights resident in VMEM (no grid, full-array blocks).
# ---------------------------------------------------------------------------
def _tail_kernel(*refs, meta):
    x_ref, o_ref = refs[0], refs[-1]
    h = x_ref[...]
    i = 1
    for use_bn, act in meta:
        w_ref, b_ref = refs[i], refs[i + 1]
        i += 2
        if use_bn:
            g, bt = refs[i][...], refs[i + 1][...]
            i += 2
        else:
            g = bt = None
        h = jnp.dot(h.astype(jnp.bfloat16), w_ref[...],
                    preferred_element_type=jnp.float32) + b_ref[...]
        h = _bn_act(h, g, bt, use_bn, act)
    o_ref[...] = h


def fused_tail(x, layers):
    M = x.shape[0]
    out_dim = layers[-1]["w"].shape[1]
    args = [x]
    meta = []
    flops = 0
    bytes_accessed = x.size * 4 + M * out_dim * 4
    for p in layers:
        n = p["w"].shape[1]
        args += [p["w"], p["b"].reshape(1, n)]
        if p["use_bn"]:
            args += [p["gamma"].reshape(1, n), p["beta"].reshape(1, n)]
        meta.append((p["use_bn"], p["act"]))
        flops += 2 * M * p["w"].shape[0] * n
        bytes_accessed += p["w"].size * 2 + (3 if p["use_bn"] else 1) * n * 4

    cost = pl.CostEstimate(flops=flops, transcendentals=M * out_dim,
                           bytes_accessed=bytes_accessed)

    return pl.pallas_call(
        functools.partial(_tail_kernel, meta=tuple(meta)),
        out_shape=jax.ShapeDtypeStruct((M, out_dim), jnp.float32),
        cost_estimate=cost,
    )(*args)


# ---------------------------------------------------------------------------
# Parameter construction (deterministic, synthetic) and forward passes.
# ---------------------------------------------------------------------------
def init_discriminator_params(key, input_dim, output_dim):
    dims = [input_dim] + _HIDDEN + [output_dim]
    n_layers = len(dims) - 1
    params = []
    for i in range(n_layers):
        fan_in, fan_out = dims[i], dims[i + 1]
        key, kw, kb = jax.random.split(key, 3)
        scale = 1.0 / jnp.sqrt(jnp.float32(fan_in))
        w = jax.random.uniform(kw, (fan_in, fan_out), jnp.float32,
                               minval=-scale, maxval=scale).astype(jnp.bfloat16)
        b = jax.random.uniform(kb, (fan_out,), jnp.float32,
                               minval=-scale, maxval=scale)
        is_last = i == n_layers - 1
        use_bn = (not is_last) and (i != 0)     # BN on hidden layers 2..7
        act = "sigmoid" if is_last else "leaky"
        params.append(dict(
            w=w, b=b,
            gamma=jnp.ones((fan_out,), jnp.float32),
            beta=jnp.zeros((fan_out,), jnp.float32),
            use_bn=use_bn, act=act))
    return params


def discriminator_forward(x, params):
    head, tail = params[:-_N_TAIL_LAYERS], params[-_N_TAIL_LAYERS:]
    for p in head:
        x = fused_linear_bn_act(x, p)
    return fused_tail(x, tail)


# Pure-JAX reference (identical bf16-weight / f32-accumulation discipline).
def discriminator_forward_ref(x, params):
    for p in params:
        h = jnp.dot(x.astype(jnp.bfloat16), p["w"],
                    preferred_element_type=jnp.float32) + p["b"]
        if p["use_bn"]:
            mean = jnp.mean(h, axis=0, keepdims=True)
            var = jnp.mean((h - mean) ** 2, axis=0, keepdims=True)
            h = (h - mean) * jax.lax.rsqrt(var + _EPS) * p["gamma"] + p["beta"]
        if p["act"] == "leaky":
            h = jnp.where(h >= 0.0, h, _NEG_SLOPE * h)
        else:
            h = 1.0 / (1.0 + jnp.exp(-h))
        x = h
    return x


if __name__ == "__main__":
    BATCH = 8          # full batch resident per block (one sublane group)
    INPUT_DIM = 128
    OUTPUT_DIM = 1

    key = jax.random.PRNGKey(0)
    key, kx = jax.random.split(key)
    x = jax.random.normal(kx, (BATCH, INPUT_DIM), jnp.float32)

    params = init_discriminator_params(key, INPUT_DIM, OUTPUT_DIM)

    out = jax.block_until_ready(discriminator_forward(x, params))
    ref = jax.block_until_ready(discriminator_forward_ref(x, params))

    assert out.shape == (BATCH, OUTPUT_DIM), out.shape
    assert bool(jnp.all(jnp.isfinite(out)))
    assert bool(jnp.allclose(out, ref, rtol=1e-3, atol=2e-3)), (out, ref)
    print("KERNEL_OK")
</pallas_src>

<mosaic_0001>
module attributes {stable_mosaic.version = 11 : i64} {
  func.func @_fused_linear_kernel(%arg0: i32, %arg1: i32, %arg2: memref<8x128xf32, #tpu.memory_space<vmem>>, %arg3: memref<128x2560xbf16, #tpu.memory_space<vmem>>, %arg4: memref<1x2560xf32, #tpu.memory_space<vmem>>, %arg5: memref<8x2560xf32, #tpu.memory_space<vmem>>) attributes {dimension_semantics = [#tpu.dimension_semantics<parallel>, #tpu.dimension_semantics<arbitrary>], iteration_bounds = array<i64: 4, 1>, scalar_prefetch = 0 : i64, scratch_operands = 0 : i64, tpu.core_type = #tpu.core_type<tc>, window_params = [{transform_indices = @transform_0, window_bounds = array<i64: 8, 128>}, {transform_indices = @transform_1, window_bounds = array<i64: 128, 2560>}, {transform_indices = @transform_2, window_bounds = array<i64: 1, 2560>}, {transform_indices = @transform_3, window_bounds = array<i64: 8, 2560>}]} {
    %c0_i32 = arith.constant 0 : i32
    %0 = arith.cmpi eq, %arg1, %c0_i32 : i32
    %1 = arith.extui %0 : i1 to i32
    %c0_i32_0 = arith.constant 0 : i32
    %2 = arith.cmpi ne, %1, %c0_i32_0 : i32
    scf.if %2 {
      %cst_10 = arith.constant 0.000000e+00 : f32
      %13 = vector.broadcast %cst_10 : f32 to vector<8x2560xf32>
      %c0_11 = arith.constant 0 : index
      %c0_12 = arith.constant 0 : index
      %14 = vector.load %arg5[%c0_11, %c0_12] : memref<8x2560xf32, #tpu.memory_space<vmem>>, vector<8x2560xf32>
      tpu.vector_store %arg5[%c0_11, %c0_12], %13 {strides = array<i32>} : memref<8x2560xf32, #tpu.memory_space<vmem>>, vector<8x2560xf32>,
    } else {
    }
    %c0 = arith.constant 0 : index
    %c0_1 = arith.constant 0 : index
    %3 = vector.load %arg5[%c0, %c0_1] : memref<8x2560xf32, #tpu.memory_space<vmem>>, vector<8x2560xf32>
    %c0_2 = arith.constant 0 : index
    %c0_3 = arith.constant 0 : index
    %4 = vector.load %arg2[%c0_2, %c0_3] : memref<8x128xf32, #tpu.memory_space<vmem>>, vector<8x128xf32>
    %5 = arith.truncf %4 : vector<8x128xf32> to vector<8x128xbf16>
    %c0_4 = arith.constant 0 : index
    %c0_5 = arith.constant 0 : index
    %6 = vector.load %arg3[%c0_4, %c0_5] : memref<128x2560xbf16, #tpu.memory_space<vmem>>, vector<128x2560xbf16>
    %cst = arith.constant dense<0.000000e+00> : vector<8x2560xf32>
    %7 = tpu.matmul %5, %6, %cst {dimension_numbers = #tpu.dot_dimension_numbers<[1], [0], [0], [1], [0, 0, 1, 1], [], []>} : vector<8x128xbf16>, vector<128x2560xbf16>, vector<8x2560xf32> -> vector<8x2560xf32>
    %8 = arith.addf %3, %7 : vector<8x2560xf32>
    %c0_6 = arith.constant 0 : index
    %c0_7 = arith.constant 0 : index
    %9 = vector.load %arg5[%c0_6, %c0_7] : memref<8x2560xf32, #tpu.memory_space<vmem>>, vector<8x2560xf32>
    tpu.vector_store %arg5[%c0_6, %c0_7], %8 {strides = array<i32>} : memref<8x2560xf32, #tpu.memory_space<vmem>>, vector<8x2560xf32>,
    %c0_i32_8 = arith.constant 0 : i32
    %10 = arith.cmpi eq, %arg1, %c0_i32_8 : i32
    %11 = arith.extui %10 : i1 to i32
    %c0_i32_9 = arith.constant 0 : i32
    %12 = arith.cmpi ne, %11, %c0_i32_9 : i32
    scf.if %12 {
      %c0_10 = arith.constant 0 : index
      %c0_11 = arith.constant 0 : index
      %13 = vector.load %arg5[%c0_10, %c0_11] : memref<8x2560xf32, #tpu.memory_space<vmem>>, vector<8x2560xf32>
      %c0_12 = arith.constant 0 : index
      %c0_13 = arith.constant 0 : index
      %14 = vector.load %arg4[%c0_12, %c0_13] : memref<1x2560xf32, #tpu.memory_space<vmem>>, vector<1x2560xf32>
      %15 = vector.broadcast %14 : vector<1x2560xf32> to vector<8x2560xf32>
      %16 = arith.addf %13, %15 : vector<8x2560xf32>
      %cst_14 = arith.constant 0.000000e+00 : f32
      %17 = vector.broadcast %cst_14 : f32 to vector<8x2560xf32>
      %18 = arith.cmpf oge, %16, %17 : vector<8x2560xf32>
      %cst_15 = arith.constant 0.00999999977 : f32
      %19 = vector.broadcast %cst_15 : f32 to vector<8x2560xf32>
      %20 = arith.mulf %19, %16 : vector<8x2560xf32>
      %21 = arith.select %18, %16, %20 : vector<8x2560xi1>, vector<8x2560xf32>
      %c0_16 = arith.constant 0 : index
      %c0_17 = arith.constant 0 : index
      %22 = vector.load %arg5[%c0_16, %c0_17] : memref<8x2560xf32, #tpu.memory_space<vmem>>, vector<8x2560xf32>
      tpu.vector_store %arg5[%c0_16, %c0_17], %21 {strides = array<i32>} : memref<8x2560xf32, #tpu.memory_space<vmem>>, vector<8x2560xf32>,
    } else {
    }
    return
  }
  func.func @transform_0(%arg0: i32, %arg1: i32) -> (i32, i32) {
    %c0_i32 = arith.constant 0 : i32
    %c0_i32_0 = arith.constant 0 : i32
    return %c0_i32, %arg1 : i32, i32
  }
  func.func @transform_1(%arg0: i32, %arg1: i32) -> (i32, i32) {
    %c0_i32 = arith.constant 0 : i32
    return %arg1, %arg0 : i32, i32
  }
  func.func @transform_2(%arg0: i32, %arg1: i32) -> (i32, i32) {
    %c0_i32 = arith.constant 0 : i32
    %c0_i32_0 = arith.constant 0 : i32
    return %c0_i32, %arg0 : i32, i32
  }
  func.func @transform_3(%arg0: i32, %arg1: i32) -> (i32, i32) {
    %c0_i32 = arith.constant 0 : i32
    %c0_i32_0 = arith.constant 0 : i32
    return %c0_i32, %arg0 : i32, i32
  }
}

</mosaic_0001>

<bundles_post_ra>
// kernel: tpu_custom_call.1
= control target key start
LH: loop header
LB: loop body
LE: loop exit
PB: predicated region body
PF: predicated region fallthrough
CT: control target
= control target key end

     0   :  { %s3294_s0 = inlined_call_operand.hbm [shape: f32[8,128], index: 0, kind: input, shape index: {}]   ;;  %s3295_s1 = inlined_call_operand.hbm [shape: bf16[128,10240], index: 1, kind: input, shape index: {}]   ;;  %s3296_s2 = inlined_call_operand.hbm [shape: f32[1,10240], index: 2, kind: input, shape index: {}]   ;;  %s3297_s3 = inlined_call_operand.hbm [shape: f32[8,10240], index: 3, kind: output, shape index: {}]  }
   0x1   :  { %3306 = sst [smem:[#allocation13_spill]] %s3295_s1 }
   0x2   :  { %8 = vsyncpa [#allocation3], 0 }
   0x3   :  { %9 = vsyncpa [#allocation6], 0 }
   0x4   :  { %11 = vsyncpa [#allocation6 + $0x1], 0 }
   0x5   :  { %12 = vsyncpa [#allocation4], 0 }
   0x6   :  { %14 = vsyncpa [#allocation4 + $0x1], 0  ;;  %s2788_s12 = smov 0   ;;  %s2790_s13 = smov 0  }
   0x7   :  { %s2792_s14 = smov 0   ;;  %s2794_s15 = smov 0  }
   0x8   :  { %s2796_s16 = smov 0   ;;  %s2798_s17 = smov 0  }
   0x9 LB: > { %s32_s18 = sadd.s32 1, %s2754_s16  ;;  %s67_s19 = sadd.s32 1, %s2746_s14  ;;  %s2758_s17 = sphi %s2798_s17, %s20_s17   ;;  %s2754_s16 = sphi %s2796_s16, %s3329_s16   ;;  %s2750_s15 = sphi %s2794_s15, %s3328_s15   ;;  %s2746_s14 = sphi %s2792_s14, %s3327_s14   ;;  %s2742_s13 = sphi %s2790_s13, %s3326_s13   ;;  %s2738_s12 = sphi %s2788_s12, %s3325_s12  }
   0xa   : > { %p34_p0 = scmp.ge.s32.totalorder %s32_s18, 4  ;;  %p74_p1 = scmp.ne.s32.totalorder %s2746_s14, %s2742_s13 }
   0xb   : > { %p75_p2 = scmp.eq.s32.totalorder %s2758_s17, 0  ;;  %p2287_p4 = scmp.lt.s32.totalorder %s2758_s17, 4 }
   0xc   : > { %s3331_s18 = smov (%p34_p0, %s32_s18), 0  ;;  %s169_s21 = sand.u32 1, %s2758_s17  }
   0xd   : > { %3307 = sst [smem:[#allocation12_spill]] %s3331_s18  ;;  %p76_p3 = por %p75_p2, %p74_p1 }
   0xe   : > { %s63_s20 = ssub.s32 %s2754_s16, %s3331_s18  ;;  %s171_s22 = sand.u32 1, %s2746_s14  }
   0xf   : > { %p65_p5 = scmp.eq.s32.totalorder %s63_s20, 0  ;;  %s2253_s23 = smul.u32 1280, %s2754_s16 }
  0x10   : > { %s2256_s25 = smul.u32 1280, %s171_s22  ;;  %s3308_s1 = sld [smem:[#allocation13_spill]] }
  0x11   : > { %s2835_s24 = scalar_select %p65_p5, %s2746_s14, %s67_s19  }
  0x12   : > { %p2844_p6 = pnand %p2287_p4, %p76_p3  ;;  %s173_s30 = scalar_lea.vmem [#allocation5], %s2256_s25 }
  0x13   : > { %s183_s4 = sshll.u32 %s173_s30, 4  ;;  %s2850_s5 = scalar_lea.sflag [#allocation6], %s169_s21  ;;  %s2848_s4 = int_to_ptr.vmem [resolvable:$true] %s183_s4 }
  0x14   : > { %s3309_s29 = scalar_select %p2844_p6, 1, 0 }
  0x15   : > { %p3300_p8 = pneg %p2844_p6 }
  0x16   : > { %s2842_s28 = scalar_lea.hbm %s3308_s1, %s2253_s23  ;;  %s2589_s9 = scalar_lea.hbm %s3308_s1, 81920 }
  0x17   : > { %s2584_s6 = scalar_lea.hbm %s2842_s28, 20480  ;;  %p2590_p11 = scmp.lt.u32.totalorder %s2842_s28, %s3308_s1 }
  0x18   : > { %p2585_p7 = scmp.ne.s32.totalorder %s2842_s28, %s2584_s6  ;;  %p2591_p12 = scmp.lt.u32.totalorder %s2589_s9, %s2584_s6 }
  0x19   : > { %p2593_p0 = scmp.lt.u32.totalorder %s2584_s6, %s2842_s28 }
  0x1a   : > { %p2587_p9 = pnand %p3300_p8, %p2585_p7  ;;  %p2592_p13 = por %p2591_p12, %p2590_p11 }
  0x1c   : > { %p2588_p10 = pneg %p2587_p9  ;;  %p2594_p2 = por %p2593_p0, %p2592_p13 }
  0x1e   : > { %p2595_p3 = pnand %p2594_p2, %p2588_p10 }
  0x20   : > { %2598 = shalt.err (!%p2595_p3)
}
  0x21   : > { %s2599_s19 = scalar_lea.vmem %s2848_s4, 20480  ;;  %s2760_s20 = smov [#allocation5]  }
  0x22   : > { %p2600_p4 = scmp.ne.s32.totalorder %s2848_s4, %s2599_s19  ;;  %s2604_s21 = sshll.u32 %s2760_s20, 4  ;;  %s2605_s21 = int_to_ptr.vmem [resolvable:$false] %s2604_s21 }
  0x23   : > { %s2606_s23 = scalar_lea.vmem %s2605_s21, 40960  ;;  %p2607_p9 = scmp.lt.s32.totalorder %s2848_s4, %s2605_s21 }
  0x24   : > { %p2602_p5 = pnand %p2600_p4, %p3300_p8  ;;  %p2608_p11 = scmp.lt.s32.totalorder %s2606_s23, %s2599_s19 }
  0x26   : > { %p2603_p7 = pneg %p2602_p5  ;;  %p2609_p12 = por %p2608_p11, %p2607_p9 }
  0x28   : > { %p2610_p13 = pnand %p2609_p12, %p2603_p7 }
  0x2a   : > { %2613 = shalt.err (!%p2610_p13)
}
  0x2b   : > { %s2761_s25 = smov 5120   ;;  %s2762_s26 = smov 1280  }
  0x2c   : > { %s2763_s27 = smov 80   ;;  %s2879_s30 = sadd.s32 4294967295, %s2758_s17  }
  0x2d   : > { %2278 = dma.hbm_to_vmem [thread:$0]  (!%p2844_p6), %s2842_s28, 20480, %s2848_s4, %s2850_s5, %s2761_s25, %s2762_s26, %s2763_s27  }
  0x2e   : > { %s2082_s6 = sadd.s32 4294967294, %s2758_s17   ;;  %p80_p10 = scmp.ne.s32.totalorder %s2742_s13, %s2738_s12 }
  0x2f   : > { %p3299_p0 = scmp.eq.s32.totalorder %s2879_s30, 0  ;;  %p130_p2 = scmp.eq.s32.totalorder %s2879_s30, 3 }
  0x30   : > { %p136_p3 = scmp.eq.s32.totalorder %s2082_s6, 3  ;;  %p2083_p5 = scmp.ge.s32.totalorder %s2758_s17, 1 }
  0x31   : > { %p2888_p4 = por %p3299_p0, %p80_p10  ;;  %p2896_p7 = por %p130_p2, %p74_p1 }
  0x32   : > { %p2900_p9 = por %p136_p3, %p80_p10  ;;  %p143_p11 = scmp.lt.s32.totalorder %s2758_s17, 5 }
  0x33   : > { %s3310_s7 = scalar_select %p2888_p4, 1, 0 }
  0x34   : > { %s3311_s28 = scalar_select %p2896_p7, 1, 0 }
  0x35   : > { %s3312_s4 = scalar_select %p2900_p9, 1, 0 }
  0x36   : > { %s2257_s8 = smul.u32 20, %s171_s22  ;;  %p2907_p12 = pnand %p2083_p5, %p143_p11 }
  0x37   : > { %s2764_s10 = smov [#allocation2]   ;;  %s2254_s19 = smul.u32 320, %s2754_s16 }
  0x38   : > { %s3313_s9 = scalar_select %p2907_p12, 1, 0 }
  0x39   : > { %s158_s11 = sshll.u32 %s2764_s10, 4  ;;  %p2271_p13 = pneg %p2907_p12  ;;  %s159_s11 = int_to_ptr.vmem [resolvable:$true] %s158_s11 }
  0x3a   : > { %s197_s20 = scalar_lea.vmem [#allocation7], %s2257_s8  ;;  %s2923_s26 = scalar_lea.hbm %s3296_s2, %s2254_s19 }
  0x3b   : > { %s205_s21 = sshll.u32 %s197_s20, 4  ;;  %p2916_p1 = pnand %p2271_p13, %p3299_p0  ;;  %s2925_s21 = int_to_ptr.vmem [resolvable:$true] %s205_s21 }
  0x3c   : > { %s2614_s10 = scalar_lea.hbm %s3294_s0, 128 }
  0x3d   : > { %p2615_p10 = scmp.ne.s32.totalorder %s3294_s0, %s2614_s10  ;;  %p2616_p2 = pneg %p2916_p1 }
  0x3e   : > { %p2621_p11 = scmp.lt.u32.totalorder %s2614_s10, %s3294_s0 }
  0x3f   : > { %p2617_p3 = pnand %p2616_p2, %p2615_p10 }
  0x41   : > { %p2618_p5 = pneg %p2617_p3 }
  0x43   : > { %p2623_p13 = pnand %p2621_p11, %p2618_p5 }
  0x45   : > { %2626 = shalt.err (!%p2623_p13)
}
  0x46   : > { %s2627_s19 = scalar_lea.vmem %s159_s11, 128  ;;  %p2635_p7 = scmp.lt.s32.totalorder %s159_s11, %s159_s11 }
  0x47   : > { %p2628_p0 = scmp.ne.s32.totalorder %s159_s11, %s2627_s19  ;;  %p2636_p4 = scmp.lt.s32.totalorder %s2627_s19, %s2627_s19 }
  0x49   : > { %p2630_p8 = pnand %p2628_p0, %p2616_p2  ;;  %p2637_p12 = por %p2636_p4, %p2635_p7 }
  0x4b   : > { %p2631_p9 = pneg %p2630_p8 }
  0x4d   : > { %p2638_p6 = pnand %p2637_p12, %p2631_p9 }
  0x4f   : > { %2641 = shalt.err (!%p2638_p6)
}
  0x50   : > { %2274 = dma.hbm_to_vmem [thread:$0]  (!%p2916_p1), %s3294_s0, 128, %s159_s11, [#allocation3]  }
  0x51   : > { %s2642_s1 = scalar_lea.hbm %s2923_s26, 320  ;;  %p3315_p0 = scmp.ne.s32.totalorder %s3309_s29, 0 }
  0x52   : > { %p2643_p10 = scmp.ne.s32.totalorder %s2923_s26, %s2642_s1  ;;  %s2647_s6 = scalar_lea.hbm %s3296_s2, 1280 }
  0x53   : > { %p3316_p8 = pneg %p3315_p0  ;;  %p2648_p6 = scmp.lt.u32.totalorder %s2923_s26, %s3296_s2 }
  0x54   : > { %p2649_p4 = scmp.lt.u32.totalorder %s2647_s6, %s2642_s1  ;;  %p2651_p9 = scmp.lt.u32.totalorder %s2642_s1, %s2923_s26 }
  0x55   : > { %p2645_p2 = pnand %p2643_p10, %p3316_p8 }
  0x56   : > { %p2650_p7 = por %p2649_p4, %p2648_p6 }
  0x57   : > { %p2646_p3 = pneg %p2645_p2 }
  0x58   : > { %p2652_p12 = por %p2651_p9, %p2650_p7 }
  0x5a   : > { %p2653_p5 = pnand %p2652_p12, %p2646_p3 }
  0x5c   : > { %2656 = shalt.err (!%p2653_p5)
}
  0x5d   : > { %s2657_s11 = scalar_lea.vmem %s2925_s21, 320  ;;  %p3317_p11 = pmov %p3316_p8 }
  0x5e   : > { %p2658_p1 = scmp.ne.s32.totalorder %s2925_s21, %s2657_s11  ;;  %s2765_s8 = smov [#allocation7]  }
  0x5f   : > { %s2662_s20 = sshll.u32 %s2765_s8, 4  ;;  %s2663_s20 = int_to_ptr.vmem [resolvable:$false] %s2662_s20 }
  0x60   : > { %p2660_p13 = pnand %p2658_p1, %p3317_p11  ;;  %s2664_s19 = scalar_lea.vmem %s2663_s20, 640 }
  0x61   : > { %p2665_p8 = scmp.lt.s32.totalorder %s2925_s21, %s2663_s20  ;;  %p2666_p2 = scmp.lt.s32.totalorder %s2664_s19, %s2657_s11 }
  0x62   : > { %p2661_p10 = pneg %p2660_p13 }
  0x63   : > { %p2667_p6 = por %p2666_p2, %p2665_p8 }
  0x65   : > { %p2668_p4 = pnand %p2667_p6, %p2661_p10 }
  0x67   : > { %2671 = shalt.err (!%p2668_p4)
}
  0x68   : > { %2281 = dma.hbm_to_vmem [thread:$0]  (!%p3315_p0), %s2923_s26, 320, %s2925_s21, %s2850_s5  }
  0x69   : > { %p3318_p3 = scmp.ne.s32.totalorder %s3313_s9, 0 }
  0x6a   : > { %p3319_p7 = scmp.eq.s32.totalorder (!%p3318_p3), %s2879_s30, 0 }
  0x6b   : > { %214 = sbr.rel (%p3318_p3) target bundleno = 515 (0x203), region = 32 }
  0x72   : > { %2725 = dma.done.wait (%p3319_p7), [#allocation3], 128   ;;  %p3320_p9 = pmov %p3319_p7 }
  0x73   : > { %s220_s25 = sand.u32 1, %s2879_s30   ;;  %s2975_s22 = sand.u32 1, %s2742_s13  }
  0x74   : > { %2727 = vsyncadd (%p3320_p9), [#allocation3], 4294967168  ;;  %s2258_s29 = smul.u32 1280, %s2975_s22  ;;  %s221_s1 = scalar_lea.sflag [#allocation6], %s220_s25 }
  0x75   : > { %p3321_p0 = scmp.ne.s32.totalorder %s3310_s7, 0 }
  0x76   : > { %s2978_s18 = scalar_lea.vmem [#allocation5], %s2258_s29 }
  0x77   : > { %2729 = dma.done.wait (%p3321_p0), %s221_s1, 20800  }
  0x78   : > { %2731 = vsyncadd (%p3321_p0), %s221_s1, 4294946496  ;;  %v2766_v0 = vmov 0   ;;  %v2344_v1 = vld [vmem:[%s2978_s18 + $0x4] ss:$80 sps:$4 sm:$0xff]   ;;  %v2346_v2 = vld [vmem:[%s2978_s18 + $0xc] ss:$80 sps:$4 sm:$0xff]  }
  0x79   : > { %1304 = vmatprep.mubr.bf16.mxu0 %v2766_v0  ;;  %1345 = vmatprep.mubr.bf16.mxu1 %v2766_v0  ;;  %v2348_v3 = vld [vmem:[%s2978_s18] ss:$80 sps:$4 sm:$0xff]   ;;  %v2349_v4 = vld [vmem:[%s2978_s18 + $0x8] ss:$80 sps:$4 sm:$0xff]   ;;  %v2350_v5 = vld [vmem:[%s2978_s18 + $0xa4] ss:$80 sps:$4 sm:$0xff]  }
  0x7a   : > { %1272 = vmatprep.subr.bf16.mxu0 %v2344_v1  ;;  %1313 = vmatprep.subr.bf16.mxu1 %v2346_v2  ;;  %v2352_v6 = vld [vmem:[%s2978_s18 + $0xac] ss:$80 sps:$4 sm:$0xff]   ;;  %v2354_v7 = vld [vmem:[%s2978_s18 + $0xa0] ss:$80 sps:$4 sm:$0xff]   ;;  %v2355_v8 = vld [vmem:[%s2978_s18 + $0xa8] ss:$80 sps:$4 sm:$0xff]  }
  0x7b   : > { %1273 = vmatpush1.bf16.msra.mxu0 %v2348_v3  ;;  %1314 = vmatpush1.bf16.msra.mxu1 %v2349_v4  ;;  %v2356_v9 = vld [vmem:[%s2978_s18 + $0x144] ss:$80 sps:$4 sm:$0xff]   ;;  %v2358_v10 = vld [vmem:[%s2978_s18 + $0x14c] ss:$80 sps:$4 sm:$0xff]   ;;  %v2360_v11 = vld [vmem:[%s2978_s18 + $0x140] ss:$80 sps:$4 sm:$0xff]  }
  0x7c   : > { %1274 = vmatprep.subr.bf16.mxu0 %v2350_v5  ;;  %1315 = vmatprep.subr.bf16.mxu1 %v2352_v6  ;;  %v2361_v12 = vld [vmem:[%s2978_s18 + $0x148] ss:$80 sps:$4 sm:$0xff]   ;;  %v2362_v13 = vld [vmem:[%s2978_s18 + $0x1e4] ss:$80 sps:$4 sm:$0xff]   ;;  %v2364_v14 = vld [vmem:[%s2978_s18 + $0x1ec] ss:$80 sps:$4 sm:$0xff]  }
  0x7d   : > { %v2366_v15 = vld [vmem:[%s2978_s18 + $0x1e0] ss:$80 sps:$4 sm:$0xff]   ;;  %v2367_v16 = vld [vmem:[%s2978_s18 + $0x1e8] ss:$80 sps:$4 sm:$0xff]   ;;  %v2368_v17 = vld [vmem:[%s2978_s18 + $0x284] ss:$80 sps:$4 sm:$0xff]  }
  0x7e   : > { %v2370_v18 = vld [vmem:[%s2978_s18 + $0x28c] ss:$80 sps:$4 sm:$0xff]   ;;  %v2372_v19 = vld [vmem:[%s2978_s18 + $0x280] ss:$80 sps:$4 sm:$0xff]   ;;  %v2373_v20 = vld [vmem:[%s2978_s18 + $0x288] ss:$80 sps:$4 sm:$0xff]  }
  0x7f   : > { %1275 = vmatpush1.bf16.msra.mxu0 %v2354_v7  ;;  %1316 = vmatpush1.bf16.msra.mxu1 %v2355_v8  ;;  %v2374_v21 = vld [vmem:[%s2978_s18 + $0x324] ss:$80 sps:$4 sm:$0xff]   ;;  %v2376_v22 = vld [vmem:[%s2978_s18 + $0x32c] ss:$80 sps:$4 sm:$0xff]   ;;  %v2378_v23 = vld [vmem:[%s2978_s18 + $0x320] ss:$80 sps:$4 sm:$0xff]  }
  0x80   : > { %1276 = vmatprep.subr.bf16.mxu0 %v2356_v9  ;;  %1317 = vmatprep.subr.bf16.mxu1 %v2358_v10  ;;  %v2379_v24 = vld [vmem:[%s2978_s18 + $0x328] ss:$80 sps:$4 sm:$0xff]   ;;  %v2380_v25 = vld [vmem:[%s2978_s18 + $0x3c4] ss:$80 sps:$4 sm:$0xff]   ;;  %v2382_v26 = vld [vmem:[%s2978_s18 + $0x3cc] ss:$80 sps:$4 sm:$0xff]  }
  0x81   : > { %v2384_v27 = vld [vmem:[%s2978_s18 + $0x3c0] ss:$80 sps:$4 sm:$0xff]   ;;  %v2385_v28 = vld [vmem:[%s2978_s18 + $0x3c8] ss:$80 sps:$4 sm:$0xff]   ;;  %v2386_v29 = vld [vmem:[%s2978_s18 + $0x464] ss:$80 sps:$4 sm:$0xff]  }
  0x82   : > { %v2388_v30 = vld [vmem:[%s2978_s18 + $0x46c] ss:$80 sps:$4 sm:$0xff]   ;;  %v2390_v31 = vld [vmem:[%s2978_s18 + $0x460] ss:$80 sps:$4 sm:$0xff]   ;;  %v2391_v32 = vld [vmem:[%s2978_s18 + $0x468] ss:$80 sps:$4 sm:$0xff]  }
  0x83   : > { %1277 = vmatpush1.bf16.msra.mxu0 %v2360_v11  ;;  %1318 = vmatpush1.bf16.msra.mxu1 %v2361_v12  ;;  %v310_v33 = vld [vmem:[#allocation2] sm:$0xff]  ;;  %v2394_v34 = vld [vmem:[%s2978_s18 + $0x14] ss:$80 sps:$4 sm:$0xff]   ;;  %v2392_v37 = vld [vmem:[%s2978_s18 + $0x10] ss:$80 sps:$4 sm:$0xff]   ;;  %s2259_s5 = smul.u32 20, %s2975_s22 }
  0x84   : > { %1278 = vmatprep.subr.bf16.mxu0 %v2362_v13  ;;  %1319 = vmatprep.subr.bf16.mxu1 %v2364_v14  ;;  %v2397_v35 = vld [vmem:[%s2978_s18 + $0x1c] ss:$80 sps:$4 sm:$0xff]   ;;  %v3020_v36 = vpack.c.bf16 %v310_v33, %v310_v33  ;;  %v2395_v38 = vld [vmem:[%s2978_s18 + $0x18] ss:$80 sps:$4 sm:$0xff]   ;;  %v2400_v39 = vld [vmem:[%s2978_s18 + $0xb4] ss:$80 sps:$4 sm:$0xff]  }
  0x85   : > { %v2403_v40 = vld [vmem:[%s2978_s18 + $0xbc] ss:$80 sps:$4 sm:$0xff]   ;;  %v2398_v41 = vld [vmem:[%s2978_s18 + $0xb0] ss:$80 sps:$4 sm:$0xff]   ;;  %v2401_v42 = vld [vmem:[%s2978_s18 + $0xb8] ss:$80 sps:$4 sm:$0xff]  }
  0x86   : > { %v2406_v43 = vld [vmem:[%s2978_s18 + $0x154] ss:$80 sps:$4 sm:$0xff]   ;;  %v2409_v44 = vld [vmem:[%s2978_s18 + $0x15c] ss:$80 sps:$4 sm:$0xff]   ;;  %v2404_v45 = vld [vmem:[%s2978_s18 + $0x150] ss:$80 sps:$4 sm:$0xff]  }
  0x87   : > { %1279 = vmatpush1.bf16.msra.mxu0 %v2366_v15  ;;  %1320 = vmatpush1.bf16.msra.mxu1 %v2367_v16  ;;  %v2407_v46 = vld [vmem:[%s2978_s18 + $0x158] ss:$80 sps:$4 sm:$0xff]   ;;  %v2412_v47 = vld [vmem:[%s2978_s18 + $0x1f4] ss:$80 sps:$4 sm:$0xff]   ;;  %v2415_v48 = vld [vmem:[%s2978_s18 + $0x1fc] ss:$80 sps:$4 sm:$0xff]  }
  0x88   : > { %1280 = vmatprep.subr.bf16.mxu0 %v2368_v17  ;;  %1321 = vmatprep.subr.bf16.mxu1 %v2370_v18  ;;  %v2410_v49 = vld [vmem:[%s2978_s18 + $0x1f0] ss:$80 sps:$4 sm:$0xff]   ;;  %v2413_v50 = vld [vmem:[%s2978_s18 + $0x1f8] ss:$80 sps:$4 sm:$0xff]   ;;  %v2418_v51 = vld [vmem:[%s2978_s18 + $0x294] ss:$80 sps:$4 sm:$0xff]  }
  0x89   : > { %v2421_v52 = vld [vmem:[%s2978_s18 + $0x29c] ss:$80 sps:$4 sm:$0xff]   ;;  %v2416_v53 = vld [vmem:[%s2978_s18 + $0x290] ss:$80 sps:$4 sm:$0xff]   ;;  %v2419_v54 = vld [vmem:[%s2978_s18 + $0x298] ss:$80 sps:$4 sm:$0xff]  }
  0x8a   : > { %v2424_v55 = vld [vmem:[%s2978_s18 + $0x334] ss:$80 sps:$4 sm:$0xff]   ;;  %v2427_v56 = vld [vmem:[%s2978_s18 + $0x33c] ss:$80 sps:$4 sm:$0xff]   ;;  %v2422_v57 = vld [vmem:[%s2978_s18 + $0x330] ss:$80 sps:$4 sm:$0xff]  }
  0x8b   : > { %1281 = vmatpush1.bf16.msra.mxu0 %v2372_v19  ;;  %1322 = vmatpush1.bf16.msra.mxu1 %v2373_v20  ;;  %v2425_v58 = vld [vmem:[%s2978_s18 + $0x338] ss:$80 sps:$4 sm:$0xff]   ;;  %v2430_v59 = vld [vmem:[%s2978_s18 + $0x3d4] ss:$80 sps:$4 sm:$0xff]   ;;  %v2433_v60 = vld [vmem:[%s2978_s18 + $0x3dc] ss:$80 sps:$4 sm:$0xff]  }
  0x8c   : > { %1282 = vmatprep.subr.bf16.mxu0 %v2374_v21  ;;  %1323 = vmatprep.subr.bf16.mxu1 %v2376_v22  ;;  %v2428_v61 = vld [vmem:[%s2978_s18 + $0x3d0] ss:$80 sps:$4 sm:$0xff]   ;;  %v2431_v62 = vld [vmem:[%s2978_s18 + $0x3d8] ss:$80 sps:$4 sm:$0xff]   ;;  %v2436_v63 = vld [vmem:[%s2978_s18 + $0x474] ss:$80 sps:$4 sm:$0xff]  }
  0x8d   : > { %v2439_v1 = vld [vmem:[%s2978_s18 + $0x47c] ss:$80 sps:$4 sm:$0xff]   ;;  %v2434_v2 = vld [vmem:[%s2978_s18 + $0x470] ss:$80 sps:$4 sm:$0xff]   ;;  %v2437_v3 = vld [vmem:[%s2978_s18 + $0x478] ss:$80 sps:$4 sm:$0xff]  }
  0x8e   : > { %v2442_v4 = vld [vmem:[%s2978_s18 + $0x24] ss:$80 sps:$4 sm:$0xff]   ;;  %v2445_v5 = vld [vmem:[%s2978_s18 + $0x2c] ss:$80 sps:$4 sm:$0xff]   ;;  %v2440_v6 = vld [vmem:[%s2978_s18 + $0x20] ss:$80 sps:$4 sm:$0xff]  }
  0x8f   : > { %1283 = vmatpush1.bf16.msra.mxu0 %v2378_v23  ;;  %1324 = vmatpush1.bf16.msra.mxu1 %v2379_v24  ;;  %v2443_v7 = vld [vmem:[%s2978_s18 + $0x28] ss:$80 sps:$4 sm:$0xff]   ;;  %v2448_v8 = vld [vmem:[%s2978_s18 + $0xc4] ss:$80 sps:$4 sm:$0xff]   ;;  %v2451_v9 = vld [vmem:[%s2978_s18 + $0xcc] ss:$80 sps:$4 sm:$0xff]  }
  0x90   : > { %1284 = vmatprep.subr.bf16.mxu0 %v2380_v25  ;;  %1325 = vmatprep.subr.bf16.mxu1 %v2382_v26  ;;  %v2446_v10 = vld [vmem:[%s2978_s18 + $0xc0] ss:$80 sps:$4 sm:$0xff]   ;;  %v2449_v11 = vld [vmem:[%s2978_s18 + $0xc8] ss:$80 sps:$4 sm:$0xff]   ;;  %v2454_v12 = vld [vmem:[%s2978_s18 + $0x164] ss:$80 sps:$4 sm:$0xff]  }
  0x91   : > { %v2457_v13 = vld [vmem:[%s2978_s18 + $0x16c] ss:$80 sps:$4 sm:$0xff]   ;;  %v2452_v14 = vld [vmem:[%s2978_s18 + $0x160] ss:$80 sps:$4 sm:$0xff]   ;;  %v2455_v15 = vld [vmem:[%s2978_s18 + $0x168] ss:$80 sps:$4 sm:$0xff]  }
  0x92   : > { %v2460_v16 = vld [vmem:[%s2978_s18 + $0x204] ss:$80 sps:$4 sm:$0xff]   ;;  %v2463_v17 = vld [vmem:[%s2978_s18 + $0x20c] ss:$80 sps:$4 sm:$0xff]   ;;  %v2458_v18 = vld [vmem:[%s2978_s18 + $0x200] ss:$80 sps:$4 sm:$0xff]  }
  0x93   : > { %1285 = vmatpush1.bf16.msra.mxu0 %v2384_v27  ;;  %1326 = vmatpush1.bf16.msra.mxu1 %v2385_v28  ;;  %v2461_v19 = vld [vmem:[%s2978_s18 + $0x208] ss:$80 sps:$4 sm:$0xff]   ;;  %v2466_v20 = vld [vmem:[%s2978_s18 + $0x2a4] ss:$80 sps:$4 sm:$0xff]   ;;  %v2469_v21 = vld [vmem:[%s2978_s18 + $0x2ac] ss:$80 sps:$4 sm:$0xff]  }
  0x94   : > { %1286 = vmatprep.subr.bf16.mxu0 %v2386_v29  ;;  %1327 = vmatprep.subr.bf16.mxu1 %v2388_v30  ;;  %v2464_v22 = vld [vmem:[%s2978_s18 + $0x2a0] ss:$80 sps:$4 sm:$0xff]   ;;  %v2467_v23 = vld [vmem:[%s2978_s18 + $0x2a8] ss:$80 sps:$4 sm:$0xff]   ;;  %v2472_v24 = vld [vmem:[%s2978_s18 + $0x344] ss:$80 sps:$4 sm:$0xff]  }
  0x95   : > { %v2475_v25 = vld [vmem:[%s2978_s18 + $0x34c] ss:$80 sps:$4 sm:$0xff]   ;;  %v2470_v26 = vld [vmem:[%s2978_s18 + $0x340] ss:$80 sps:$4 sm:$0xff]   ;;  %v2473_v27 = vld [vmem:[%s2978_s18 + $0x348] ss:$80 sps:$4 sm:$0xff]  }
  0x96   : > { %v2478_v28 = vld [vmem:[%s2978_s18 + $0x3e4] ss:$80 sps:$4 sm:$0xff]   ;;  %v2481_v29 = vld [vmem:[%s2978_s18 + $0x3ec] ss:$80 sps:$4 sm:$0xff]   ;;  %v2476_v30 = vld [vmem:[%s2978_s18 + $0x3e0] ss:$80 sps:$4 sm:$0xff]  }
  0x97   : > { %1287 = vmatpush1.bf16.msra.mxu0 %v2390_v31  ;;  %1328 = vmatpush1.bf16.msra.mxu1 %v2391_v32  ;;  %v2479_v31 = vld [vmem:[%s2978_s18 + $0x3e8] ss:$80 sps:$4 sm:$0xff]   ;;  %v2484_v32 = vld [vmem:[%s2978_s18 + $0x484] ss:$80 sps:$4 sm:$0xff]   ;;  %v2487_v33 = vld [vmem:[%s2978_s18 + $0x48c] ss:$80 sps:$4 sm:$0xff]  }
  0x98   : > { %1354 = vmatprep.subr.bf16.mxu0 %v2394_v34  ;;  %1395 = vmatprep.subr.bf16.mxu1 %v2397_v35  ;;  %v2482_v34 = vld [vmem:[%s2978_s18 + $0x480] ss:$80 sps:$4 sm:$0xff]   ;;  %v2485_v35 = vld [vmem:[%s2978_s18 + $0x488] ss:$80 sps:$4 sm:$0xff]   ;;  %s3175_s30 = scalar_lea.vmem [#allocation7], %s2259_s5  ;;  %s2260_s7 = smul.u32 160, %s2975_s22 }
  0x99   : > { %s2255_s21 = smul.u32 2560, %s2750_s15  ;;  %s1952_s23 = scalar_lea.sflag [#allocation4], %s2975_s22 }
  0x9a   : > { %1305 = vmatmul.mubr.bf16.vlgmr.msra.gmra.mrb[0].mxu0 %v3020_v36  ;;  %1346 = vmatmul.mubr.bf16.vlgmr.msra.gmra.mrb[0].mxu1 %v3020_v36  ;;  %s3189_s9 = scalar_lea.vmem [#allocation8], %s2260_s7  ;;  %p3322_p5 = scmp.ne.s32.totalorder %s3311_s28, 0 }
  0x9b   : > { %1355 = vmatpush1.bf16.msra.mxu0 %v2392_v37  ;;  %1396 = vmatpush1.bf16.msra.mxu1 %v2395_v38  ;;  %v2490_v37 = vld [vmem:[%s2978_s18 + $0x34] ss:$80 sps:$4 sm:$0xff]   ;;  %v2493_v38 = vld [vmem:[%s2978_s18 + $0x3c] ss:$80 sps:$4 sm:$0xff]   ;;  %s1966_s26 = sshll.u32 %s3189_s9, 4  ;;  %s3242_s6 = scalar_lea.hbm %s3297_s3, %s2255_s21  ;;  %s3244_s26 = int_to_ptr.vmem [resolvable:$true] %s1966_s26 }
  0x9c   : > { %1356 = vmatprep.subr.bf16.mxu0 %v2400_v39  ;;  %1397 = vmatprep.subr.bf16.mxu1 %v2403_v40  ;;  %v2488_v39 = vld [vmem:[%s2978_s18 + $0x30] ss:$80 sps:$4 sm:$0xff]   ;;  %v2491_v40 = vld [vmem:[%s2978_s18 + $0x38] ss:$80 sps:$4 sm:$0xff]   ;;  %s2672_s10 = scalar_lea.vmem %s3244_s26, 2560  ;;  %s2767_s11 = smov [#allocation8]  }
  0x9d   : > { %1386 = vmatprep.mubr.bf16.mxu0 %v2766_v0  ;;  %1427 = vmatprep.mubr.bf16.mxu1 %v2766_v0  ;;  %p2673_p12 = scmp.ne.s32.totalorder %s3244_s26, %s2672_s10  ;;  %s2676_s8 = sshll.u32 %s2767_s11, 4  ;;  %s2677_s8 = int_to_ptr.vmem [resolvable:$false] %s2676_s8 }
  0x9e   : > { %s2678_s20 = scalar_lea.vmem %s2677_s8, 5120  ;;  %p2679_p13 = scmp.lt.s32.totalorder %s3244_s26, %s2677_s8 }
  0x9f   : > { %1357 = vmatpush1.bf16.msra.mxu0 %v2398_v41  ;;  %1398 = vmatpush1.bf16.msra.mxu1 %v2401_v42  ;;  %v2496_v41 = vld [vmem:[%s2978_s18 + $0xd4] ss:$80 sps:$4 sm:$0xff]   ;;  %v2499_v42 = vld [vmem:[%s2978_s18 + $0xdc] ss:$80 sps:$4 sm:$0xff]   ;;  %p2674_p1 = pnand %p2673_p12, %p3322_p5  ;;  %p2680_p10 = scmp.lt.s32.totalorder %s2678_s20, %s2672_s10 }
  0xa0   : > { %1358 = vmatprep.subr.bf16.mxu0 %v2406_v43  ;;  %1399 = vmatprep.subr.bf16.mxu1 %v2409_v44  ;;  %v2494_v43 = vld [vmem:[%s2978_s18 + $0xd0] ss:$80 sps:$4 sm:$0xff]   ;;  %v2497_v44 = vld [vmem:[%s2978_s18 + $0xd8] ss:$80 sps:$4 sm:$0xff]  }
  0xa1   : > { %p2675_p11 = pneg %p2674_p1  ;;  %p2681_p8 = por %p2680_p10, %p2679_p13 }
  0xa3   : > { %1359 = vmatpush1.bf16.msra.mxu0 %v2404_v45  ;;  %1400 = vmatpush1.bf16.msra.mxu1 %v2407_v46  ;;  %v2502_v45 = vld [vmem:[%s2978_s18 + $0x174] ss:$80 sps:$4 sm:$0xff]   ;;  %v2505_v46 = vld [vmem:[%s2978_s18 + $0x17c] ss:$80 sps:$4 sm:$0xff]   ;;  %p2682_p2 = pnand %p2681_p8, %p2675_p11 }
  0xa4   : > { %1360 = vmatprep.subr.bf16.mxu0 %v2412_v47  ;;  %1401 = vmatprep.subr.bf16.mxu1 %v2415_v48  ;;  %v2500_v47 = vld [vmem:[%s2978_s18 + $0x170] ss:$80 sps:$4 sm:$0xff]   ;;  %v2503_v48 = vld [vmem:[%s2978_s18 + $0x178] ss:$80 sps:$4 sm:$0xff]  }
  0xa7   : > { %1361 = vmatpush1.bf16.msra.mxu0 %v2410_v49  ;;  %1402 = vmatpush1.bf16.msra.mxu1 %v2413_v50  ;;  %v2508_v49 = vld [vmem:[%s2978_s18 + $0x214] ss:$80 sps:$4 sm:$0xff]   ;;  %v2511_v50 = vld [vmem:[%s2978_s18 + $0x21c] ss:$80 sps:$4 sm:$0xff]  }
  0xa8   : > { %1362 = vmatprep.subr.bf16.mxu0 %v2418_v51  ;;  %1403 = vmatprep.subr.bf16.mxu1 %v2421_v52  ;;  %v2506_v51 = vld [vmem:[%s2978_s18 + $0x210] ss:$80 sps:$4 sm:$0xff]   ;;  %v2509_v52 = vld [vmem:[%s2978_s18 + $0x218] ss:$80 sps:$4 sm:$0xff]  }
  0xab   : > { %1363 = vmatpush1.bf16.msra.mxu0 %v2416_v53  ;;  %1404 = vmatpush1.bf16.msra.mxu1 %v2419_v54  ;;  %v2514_v53 = vld [vmem:[%s2978_s18 + $0x2b4] ss:$80 sps:$4 sm:$0xff]   ;;  %v2517_v54 = vld [vmem:[%s2978_s18 + $0x2bc] ss:$80 sps:$4 sm:$0xff]  }
  0xac   : > { %1364 = vmatprep.subr.bf16.mxu0 %v2424_v55  ;;  %1405 = vmatprep.subr.bf16.mxu1 %v2427_v56  ;;  %v2512_v55 = vld [vmem:[%s2978_s18 + $0x2b0] ss:$80 sps:$4 sm:$0xff]   ;;  %v2515_v56 = vld [vmem:[%s2978_s18 + $0x2b8] ss:$80 sps:$4 sm:$0xff]  }
  0xaf   : > { %1365 = vmatpush1.bf16.msra.mxu0 %v2422_v57  ;;  %1406 = vmatpush1.bf16.msra.mxu1 %v2425_v58  ;;  %v2520_v57 = vld [vmem:[%s2978_s18 + $0x354] ss:$80 sps:$4 sm:$0xff]   ;;  %v2523_v58 = vld [vmem:[%s2978_s18 + $0x35c] ss:$80 sps:$4 sm:$0xff]  }
  0xb0   : > { %1366 = vmatprep.subr.bf16.mxu0 %v2430_v59  ;;  %1407 = vmatprep.subr.bf16.mxu1 %v2433_v60  ;;  %v2518_v59 = vld [vmem:[%s2978_s18 + $0x350] ss:$80 sps:$4 sm:$0xff]   ;;  %v2521_v60 = vld [vmem:[%s2978_s18 + $0x358] ss:$80 sps:$4 sm:$0xff]  }
  0xb3   : > { %1367 = vmatpush1.bf16.msra.mxu0 %v2428_v61  ;;  %1408 = vmatpush1.bf16.msra.mxu1 %v2431_v62  ;;  %v2526_v61 = vld [vmem:[%s2978_s18 + $0x3f4] ss:$80 sps:$4 sm:$0xff]   ;;  %v2529_v62 = vld [vmem:[%s2978_s18 + $0x3fc] ss:$80 sps:$4 sm:$0xff]  }
  0xb4   : > { %1368 = vmatprep.subr.bf16.mxu0 %v2436_v63  ;;  %1409 = vmatprep.subr.bf16.mxu1 %v2439_v1  ;;  %v2524_v63 = vld [vmem:[%s2978_s18 + $0x3f0] ss:$80 sps:$4 sm:$0xff]   ;;  %v2527_v1 = vld [vmem:[%s2978_s18 + $0x3f8] ss:$80 sps:$4 sm:$0xff]  }
  0xb7   : > { %1369 = vmatpush1.bf16.msra.mxu0 %v2434_v2  ;;  %1410 = vmatpush1.bf16.msra.mxu1 %v2437_v3  ;;  %v2532_v2 = vld [vmem:[%s2978_s18 + $0x494] ss:$80 sps:$4 sm:$0xff]   ;;  %v2535_v3 = vld [vmem:[%s2978_s18 + $0x49c] ss:$80 sps:$4 sm:$0xff]  }
  0xb8   : > { %1436 = vmatprep.subr.bf16.mxu0 %v2442_v4  ;;  %1477 = vmatprep.subr.bf16.mxu1 %v2445_v5  ;;  %v2530_v4 = vld [vmem:[%s2978_s18 + $0x490] ss:$80 sps:$4 sm:$0xff]   ;;  %v2533_v5 = vld [vmem:[%s2978_s18 + $0x498] ss:$80 sps:$4 sm:$0xff]  }
  0xba   : > { %1387 = vmatmul.mubr.bf16.vlgmr.msra.gmra.mrb[4].mxu0 %v3020_v36  ;;  %1428 = vmatmul.mubr.bf16.vlgmr.msra.gmra.mrb[4].mxu1 %v3020_v36 }
  0xbb   : > { %1437 = vmatpush1.bf16.msra.mxu0 %v2440_v6  ;;  %1478 = vmatpush1.bf16.msra.mxu1 %v2443_v7  ;;  %v2538_v6 = vld [vmem:[%s2978_s18 + $0x44] ss:$80 sps:$4 sm:$0xff]   ;;  %v2541_v7 = vld [vmem:[%s2978_s18 + $0x4c] ss:$80 sps:$4 sm:$0xff]  }
  0xbc   : > { %1438 = vmatprep.subr.bf16.mxu0 %v2448_v8  ;;  %1479 = vmatprep.subr.bf16.mxu1 %v2451_v9  ;;  %v2536_v8 = vld [vmem:[%s2978_s18 + $0x40] ss:$80 sps:$4 sm:$0xff]   ;;  %v2539_v9 = vld [vmem:[%s2978_s18 + $0x48] ss:$80 sps:$4 sm:$0xff]  }
  0xbd   : > { %1468 = vmatprep.mubr.bf16.mxu0 %v2766_v0  ;;  %1509 = vmatprep.mubr.bf16.mxu1 %v2766_v0 }
  0xbf   : > { %1439 = vmatpush1.bf16.msra.mxu0 %v2446_v10  ;;  %1480 = vmatpush1.bf16.msra.mxu1 %v2449_v11  ;;  %v2544_v10 = vld [vmem:[%s2978_s18 + $0xe4] ss:$80 sps:$4 sm:$0xff]   ;;  %v2547_v11 = vld [vmem:[%s2978_s18 + $0xec] ss:$80 sps:$4 sm:$0xff]  }
  0xc0   : > { %1440 = vmatprep.subr.bf16.mxu0 %v2454_v12  ;;  %1481 = vmatprep.subr.bf16.mxu1 %v2457_v13  ;;  %v2542_v12 = vld [vmem:[%s2978_s18 + $0xe0] ss:$80 sps:$4 sm:$0xff]   ;;  %v2545_v13 = vld [vmem:[%s2978_s18 + $0xe8] ss:$80 sps:$4 sm:$0xff]  }
  0xc3   : > { %1441 = vmatpush1.bf16.msra.mxu0 %v2452_v14  ;;  %1482 = vmatpush1.bf16.msra.mxu1 %v2455_v15  ;;  %v2550_v14 = vld [vmem:[%s2978_s18 + $0x184] ss:$80 sps:$4 sm:$0xff]   ;;  %v2553_v15 = vld [vmem:[%s2978_s18 + $0x18c] ss:$80 sps:$4 sm:$0xff]  }
  0xc4   : > { %1442 = vmatprep.subr.bf16.mxu0 %v2460_v16  ;;  %1483 = vmatprep.subr.bf16.mxu1 %v2463_v17  ;;  %v2548_v16 = vld [vmem:[%s2978_s18 + $0x180] ss:$80 sps:$4 sm:$0xff]   ;;  %v2551_v17 = vld [vmem:[%s2978_s18 + $0x188] ss:$80 sps:$4 sm:$0xff]  }
  0xc7   : > { %1443 = vmatpush1.bf16.msra.mxu0 %v2458_v18  ;;  %1484 = vmatpush1.bf16.msra.mxu1 %v2461_v19  ;;  %v2556_v18 = vld [vmem:[%s2978_s18 + $0x224] ss:$80 sps:$4 sm:$0xff]   ;;  %v2559_v19 = vld [vmem:[%s2978_s18 + $0x22c] ss:$80 sps:$4 sm:$0xff]  }
  0xc8   : > { %1444 = vmatprep.subr.bf16.mxu0 %v2466_v20  ;;  %1485 = vmatprep.subr.bf16.mxu1 %v2469_v21  ;;  %v2554_v20 = vld [vmem:[%s2978_s18 + $0x220] ss:$80 sps:$4 sm:$0xff]   ;;  %v2557_v21 = vld [vmem:[%s2978_s18 + $0x228] ss:$80 sps:$4 sm:$0xff]  }
  0xcb   : > { %1445 = vmatpush1.bf16.msra.mxu0 %v2464_v22  ;;  %1486 = vmatpush1.bf16.msra.mxu1 %v2467_v23  ;;  %v2565_v22 = vld [vmem:[%s2978_s18 + $0x2cc] ss:$80 sps:$4 sm:$0xff]   ;;  %v2560_v23 = vld [vmem:[%s2978_s18 + $0x2c0] ss:$80 sps:$4 sm:$0xff]  }
  0xcc   : > { %1446 = vmatprep.subr.bf16.mxu0 %v2472_v24  ;;  %1487 = vmatprep.subr.bf16.mxu1 %v2475_v25  ;;  %v2563_v24 = vld [vmem:[%s2978_s18 + $0x2c8] ss:$80 sps:$4 sm:$0xff]   ;;  %v2568_v25 = vld [vmem:[%s2978_s18 + $0x364] ss:$80 sps:$4 sm:$0xff]  }
  0xcf   : > { %1447 = vmatpush1.bf16.msra.mxu0 %v2470_v26  ;;  %1488 = vmatpush1.bf16.msra.mxu1 %v2473_v27  ;;  %v2571_v26 = vld [vmem:[%s2978_s18 + $0x36c] ss:$80 sps:$4 sm:$0xff]   ;;  %v2566_v27 = vld [vmem:[%s2978_s18 + $0x360] ss:$80 sps:$4 sm:$0xff]  }
  0xd0   : > { %1448 = vmatprep.subr.bf16.mxu0 %v2478_v28  ;;  %1489 = vmatprep.subr.bf16.mxu1 %v2481_v29  ;;  %v2569_v28 = vld [vmem:[%s2978_s18 + $0x368] ss:$80 sps:$4 sm:$0xff]   ;;  %v2574_v29 = vld [vmem:[%s2978_s18 + $0x404] ss:$80 sps:$4 sm:$0xff]  }
  0xd3   : > { %1449 = vmatpush1.bf16.msra.mxu0 %v2476_v30  ;;  %1490 = vmatpush1.bf16.msra.mxu1 %v2479_v31  ;;  %v2577_v30 = vld [vmem:[%s2978_s18 + $0x40c] ss:$80 sps:$4 sm:$0xff]   ;;  %v2572_v31 = vld [vmem:[%s2978_s18 + $0x400] ss:$80 sps:$4 sm:$0xff]  }
  0xd4   : > { %1450 = vmatprep.subr.bf16.mxu0 %v2484_v32  ;;  %1491 = vmatprep.subr.bf16.mxu1 %v2487_v33  ;;  %v2575_v32 = vld [vmem:[%s2978_s18 + $0x408] ss:$80 sps:$4 sm:$0xff]   ;;  %v2580_v33 = vld [vmem:[%s2978_s18 + $0x4a4] ss:$80 sps:$4 sm:$0xff]  }
  0xd7   : > { %1451 = vmatpush1.bf16.msra.mxu0 %v2482_v34  ;;  %1492 = vmatpush1.bf16.msra.mxu1 %v2485_v35  ;;  %v2583_v34 = vld [vmem:[%s2978_s18 + $0x4ac] ss:$80 sps:$4 sm:$0xff]   ;;  %v2578_v35 = vld [vmem:[%s2978_s18 + $0x4a0] ss:$80 sps:$4 sm:$0xff]  }
  0xd8   : > { %1518 = vmatprep.subr.bf16.mxu0 %v2490_v37  ;;  %1559 = vmatprep.subr.bf16.mxu1 %v2493_v38  ;;  %v2581_v37 = vld [vmem:[%s2978_s18 + $0x4a8] ss:$80 sps:$4 sm:$0xff]   ;;  %v1751_v38 = vlaneseq }
  0xda   : > { %1469 = vmatmul.mubr.bf16.vlgmr.msra.gmra.mrb[8].mxu0 %v3020_v36  ;;  %1510 = vmatmul.mubr.bf16.vlgmr.msra.gmra.mrb[8].mxu1 %v3020_v36 }
  0xdb   : > { %1519 = vmatpush1.bf16.msra.mxu0 %v2488_v39  ;;  %1560 = vmatpush1.bf16.msra.mxu1 %v2491_v40  ;;  %v3167_v39 = vshrl.u32 %v1751_v38, 7 }
  0xdc   : > { %1520 = vmatprep.subr.bf16.mxu0 %v2496_v41  ;;  %1561 = vmatprep.subr.bf16.mxu1 %v2499_v42  ;;  %v1745_v42 = vld [vmem:[%s3175_s30] sm:$0xff] }
  0xdd   : > { %1550 = vmatprep.mubr.bf16.mxu0 %v2766_v0  ;;  %1591 = vmatprep.mubr.bf16.mxu1 %v2766_v0  ;;  %v3170_v40 = vsub.s32 0, %v3167_v39  ;;  %v3173_v41 = vsub.s32 2, %v3167_v39 }
  0xdf   : > { %1521 = vmatpush1.bf16.msra.mxu0 %v2494_v43  ;;  %1562 = vmatpush1.bf16.msra.mxu1 %v2497_v44  ;;  %v3179_v43 = vsub.s32 1, %v3167_v39  ;;  %v3182_v44 = vsub.s32 3, %v3167_v39 }
  0xe0   : > { %1522 = vmatprep.subr.bf16.mxu0 %v2502_v45  ;;  %1563 = vmatprep.subr.bf16.mxu1 %v2505_v46  ;;  %v1762_v45 = vrot.slane %v1745_v42, %v3173_v41 }
  0xe3   : > { %1523 = vmatpush1.bf16.msra.mxu0 %v2500_v47  ;;  %1564 = vmatpush1.bf16.msra.mxu1 %v2503_v48  ;;  %v1758_v48 = vrot.slane %v1745_v42, %v3179_v43 }
  0xe4   : > { %1524 = vmatprep.subr.bf16.mxu0 %v2508_v49  ;;  %1565 = vmatprep.subr.bf16.mxu1 %v2511_v50  ;;  %v1766_v49 = vrot.slane %v1745_v42, %v3182_v44 }
  0xe7   : > { %1525 = vmatpush1.bf16.msra.mxu0 %v2506_v51  ;;  %1566 = vmatpush1.bf16.msra.mxu1 %v2509_v52 }
  0xe8   : > { %1526 = vmatprep.subr.bf16.mxu0 %v2514_v53  ;;  %1567 = vmatprep.subr.bf16.mxu1 %v2517_v54 }
  0xeb   : > { %1527 = vmatpush1.bf16.msra.mxu0 %v2512_v55  ;;  %1568 = vmatpush1.bf16.msra.mxu1 %v2515_v56 }
  0xec   : > { %1528 = vmatprep.subr.bf16.mxu0 %v2520_v57  ;;  %1569 = vmatprep.subr.bf16.mxu1 %v2523_v58 }
  0xef   : > { %1529 = vmatpush1.bf16.msra.mxu0 %v2518_v59  ;;  %1570 = vmatpush1.bf16.msra.mxu1 %v2521_v60 }
  0xf0   : > { %1530 = vmatprep.subr.bf16.mxu0 %v2526_v61  ;;  %1571 = vmatprep.subr.bf16.mxu1 %v2529_v62 }
  0xf3   : > { %1531 = vmatpush1.bf16.msra.mxu0 %v2524_v63  ;;  %1572 = vmatpush1.bf16.msra.mxu1 %v2527_v1 }
  0xf4   : > { %1532 = vmatprep.subr.bf16.mxu0 %v2532_v2  ;;  %1573 = vmatprep.subr.bf16.mxu1 %v2535_v3 }
  0xf7   : > { %1533 = vmatpush1.bf16.msra.mxu0 %v2530_v4  ;;  %1574 = vmatpush1.bf16.msra.mxu1 %v2533_v5  ;;  %v1769_v5 = vsub.s32 4, %v3167_v39 }
  0xf8   : > { %1600 = vmatprep.subr.bf16.mxu0 %v2538_v6  ;;  %1641 = vmatprep.subr.bf16.mxu1 %v2541_v7  ;;  %v1777_v6 = vsub.s32 6, %v3167_v39  ;;  %v1773_v7 = vsub.s32 5, %v3167_v39 }
  0xfa   : > { %1551 = vmatmul.mubr.bf16.vlgmr.msra.gmra.mrb[12].mxu0 %v3020_v36  ;;  %1592 = vmatmul.mubr.bf16.vlgmr.msra.gmra.mrb[12].mxu1 %v3020_v36 }
  0xfb   : > { %1601 = vmatpush1.bf16.msra.mxu0 %v2536_v8  ;;  %1642 = vmatpush1.bf16.msra.mxu1 %v2539_v9  ;;  %v1781_v8 = vsub.s32 7, %v3167_v39  ;;  %v1770_v9 = vrot.slane %v1745_v42, %v1769_v5 }
  0xfc   : > { %1602 = vmatprep.subr.bf16.mxu0 %v2544_v10  ;;  %1643 = vmatprep.subr.bf16.mxu1 %v2547_v11  ;;  %v1778_v10 = vrot.slane %v1745_v42, %v1777_v6 }
  0xfd   : > { %1632 = vmatprep.mubr.bf16.mxu0 %v2766_v0  ;;  %1673 = vmatprep.mubr.bf16.mxu1 %v2766_v0  ;;  %v2562_v0 = vld [vmem:[%s2978_s18 + $0x2c4] ss:$80 sps:$4 sm:$0xff]  }
  0xff   : > { %1603 = vmatpush1.bf16.msra.mxu0 %v2542_v12  ;;  %1644 = vmatpush1.bf16.msra.mxu1 %v2545_v13  ;;  %v1774_v13 = vrot.slane %v1745_v42, %v1773_v7 }
 0x100   : > { %1604 = vmatprep.subr.bf16.mxu0 %v2550_v14  ;;  %1645 = vmatprep.subr.bf16.mxu1 %v2553_v15  ;;  %v1782_v14 = vrot.slane %v1745_v42, %v1781_v8 }
 0x103   : > { %1605 = vmatpush1.bf16.msra.mxu0 %v2548_v16  ;;  %1646 = vmatpush1.bf16.msra.mxu1 %v2551_v17 }
 0x104   : > { %1606 = vmatprep.subr.bf16.mxu0 %v2556_v18  ;;  %1647 = vmatprep.subr.bf16.mxu1 %v2559_v19 }
 0x107   : > { %1607 = vmatpush1.bf16.msra.mxu0 %v2554_v20  ;;  %1648 = vmatpush1.bf16.msra.mxu1 %v2557_v21 }
 0x108   : > { %1608 = vmatprep.subr.bf16.mxu0 %v2562_v0  ;;  %1649 = vmatprep.subr.bf16.mxu1 %v2565_v22 }
 0x10b   : > { %1609 = vmatpush1.bf16.msra.mxu0 %v2560_v23  ;;  %1650 = vmatpush1.bf16.msra.mxu1 %v2563_v24 }
 0x10c   : > { %1610 = vmatprep.subr.bf16.mxu0 %v2568_v25  ;;  %1651 = vmatprep.subr.bf16.mxu1 %v2571_v26 }
 0x10f   : > { %1611 = vmatpush1.bf16.msra.mxu0 %v2566_v27  ;;  %1652 = vmatpush1.bf16.msra.mxu1 %v2569_v28 }
 0x110   : > { %1612 = vmatprep.subr.bf16.mxu0 %v2574_v29  ;;  %1653 = vmatprep.subr.bf16.mxu1 %v2577_v30 }
 0x113   : > { %1613 = vmatpush1.bf16.msra.mxu0 %v2572_v31  ;;  %1654 = vmatpush1.bf16.msra.mxu1 %v2575_v32  ;;  %v1746_v32 = vld [vmem:[%s3175_s30 + $0x8] sm:$0xff] }
 0x114   : > { %1614 = vmatprep.subr.bf16.mxu0 %v2580_v33  ;;  %1655 = vmatprep.subr.bf16.mxu1 %v2583_v34  ;;  %v1786_v33 = vrot.slane %v1746_v32, %v3170_v40  ;;  %v1794_v34 = vrot.slane %v1746_v32, %v3173_v41  ;;  %v1790_v38 = vrot.slane %v1746_v32, %v3179_v43 }
 0x117   : > { %1615 = vmatpush1.bf16.msra.mxu0 %v2578_v35  ;;  %1656 = vmatpush1.bf16.msra.mxu1 %v2581_v37 }
 0x11a   : > { %1633 = vmatmul.mubr.bf16.vlgmr.msra.gmra.mrb[16].mxu0 %v3020_v36  ;;  %1674 = vmatmul.mubr.bf16.vlgmr.msra.gmra.mrb[16].mxu1 %v3020_v36  ;;  %v1754_v36 = vrot.slane %v1745_v42, %v3170_v40  ;;  %v1798_v42 = vrot.slane %v1746_v32, %v3182_v44 }
 0x16d   : > { %v1306_v46 = vpop.f32.mrb[0].mxu0  ;;  %v1347_v47 = vpop.f32.mrb[0].mxu1 }
 0x16e   : > { %v1308_v50 = vpop.f32.mrb[1].mxu0  ;;  %v1349_v51 = vpop.f32.mrb[1].mxu1  ;;  %v1851_v54 = vadd.f32 %v1754_v36, %v1306_v46  ;;  %v1853_v55 = vadd.f32 %v1762_v45, %v1347_v47 }
 0x16f   : > { %v1310_v52 = vpop.f32.mrb[2].mxu0  ;;  %v1351_v53 = vpop.f32.mrb[2].mxu1  ;;  %v1852_v58 = vadd.f32 %v1758_v48, %v1308_v50  ;;  %v1854_v59 = vadd.f32 %v1766_v49, %v1349_v51 }
 0x170   : > { %v1311_v56 = vpop.f32.mrb[3].mxu0  ;;  %v1352_v57 = vpop.f32.mrb[3].mxu1  ;;  %vm1871_vm0 = vcmp.ge.f32.partialorder %v1851_v54, 0.0  ;;  %v1891_v60 = vmul.f32 0.01, %v1851_v54  ;;  %vm1873_vm1 = vcmp.ge.f32.partialorder %v1853_v55, 0.0 }
 0x171   : > { %v1893_v61 = vmul.f32 0.01, %v1853_v55  ;;  %vm1872_vm2 = vcmp.ge.f32.partialorder %v1852_v58, 0.0  ;;  %v1892_v62 = vmul.f32 0.01, %v1852_v58  ;;  %vm1874_vm3 = vcmp.ge.f32.partialorder %v1854_v59, 0.0 }
 0x172   : > { %v1894_v63 = vmul.f32 0.01, %v1854_v59  ;;  %v1911_v1 = vsel %vm1871_vm0, %v1851_v54, %v1891_v60 }
 0x173   : > { %v1913_v2 = vsel %vm1873_vm1, %v1853_v55, %v1893_v61  ;;  %1931 = vst [vmem:[%s3189_s9] sm:$0xff] %v1911_v1  ;;  %v1912_v3 = vsel %vm1872_vm2, %v1852_v58, %v1892_v62  ;;  %v1802_v62 = vrot.slane %v1746_v32, %v1769_v5 }
 0x174   : > { %1933 = vst [vmem:[%s3189_s9 + $0x10] sm:$0xff] %v1913_v2  ;;  %v1914_v4 = vsel %vm1874_vm3, %v1854_v59, %v1894_v63  ;;  %1932 = vst [vmem:[%s3189_s9 + $0x8] sm:$0xff] %v1912_v3  ;;  %v1810_v63 = vrot.slane %v1746_v32, %v1777_v6  ;;  %v1806_v3 = vrot.slane %v1746_v32, %v1773_v7 }
 0x175   : > { %1934 = vst [vmem:[%s3189_s9 + $0x18] sm:$0xff] %v1914_v4  ;;  %v1814_v4 = vrot.slane %v1746_v32, %v1781_v8 }
 0x18d   : > { %v1388_v11 = vpop.f32.mrb[4].mxu0  ;;  %v1429_v12 = vpop.f32.mrb[4].mxu1 }
 0x18e   : > { %v1390_v15 = vpop.f32.mrb[5].mxu0  ;;  %v1431_v16 = vpop.f32.mrb[5].mxu1  ;;  %v1855_v19 = vadd.f32 %v1770_v9, %v1388_v11  ;;  %v1857_v20 = vadd.f32 %v1778_v10, %v1429_v12 }
 0x18f   : > { %v1392_v17 = vpop.f32.mrb[6].mxu0  ;;  %v1433_v18 = vpop.f32.mrb[6].mxu1  ;;  %v1856_v22 = vadd.f32 %v1774_v13, %v1390_v15  ;;  %v1858_v23 = vadd.f32 %v1782_v14, %v1431_v16 }
 0x190   : > { %v1393_v21 = vpop.f32.mrb[7].mxu0  ;;  %v1434_v0 = vpop.f32.mrb[7].mxu1  ;;  %vm1875_vm4 = vcmp.ge.f32.partialorder %v1855_v19, 0.0  ;;  %v1895_v24 = vmul.f32 0.01, %v1855_v19  ;;  %vm1877_vm5 = vcmp.ge.f32.partialorder %v1857_v20, 0.0 }
 0x191   : > { %v1897_v25 = vmul.f32 0.01, %v1857_v20  ;;  %vm1876_vm6 = vcmp.ge.f32.partialorder %v1856_v22, 0.0  ;;  %v1896_v26 = vmul.f32 0.01, %v1856_v22  ;;  %vm1878_vm7 = vcmp.ge.f32.partialorder %v1858_v23, 0.0 }
 0x192   : > { %v1898_v27 = vmul.f32 0.01, %v1858_v23  ;;  %v1915_v28 = vsel %vm1875_vm4, %v1855_v19, %v1895_v24  ;;  %v1747_v0 = vld [vmem:[%s3175_s30 + $0x10] sm:$0xf] }
 0x193   : > { %v1917_v29 = vsel %vm1877_vm5, %v1857_v20, %v1897_v25  ;;  %1935 = vst [vmem:[%s3189_s9 + $0x20] sm:$0xff] %v1915_v28  ;;  %v1916_v30 = vsel %vm1876_vm6, %v1856_v22, %v1896_v26  ;;  %v1818_v22 = vrot.slane %v1747_v0, %v3170_v40  ;;  %v1822_v26 = vrot.slane %v1747_v0, %v3179_v43 }
 0x194   : > { %1937 = vst [vmem:[%s3189_s9 + $0x30] sm:$0xff] %v1917_v29  ;;  %v1918_v31 = vsel %vm1878_vm7, %v1858_v23, %v1898_v27  ;;  %1936 = vst [vmem:[%s3189_s9 + $0x28] sm:$0xff] %v1916_v30  ;;  %v1826_v23 = vrot.slane %v1747_v0, %v3173_v41  ;;  %v1830_v27 = vrot.slane %v1747_v0, %v3182_v44 }
 0x195   : > { %1938 = vst [vmem:[%s3189_s9 + $0x38] sm:$0xff] %v1918_v31 }
 0x1ad   : > { %v1470_v35 = vpop.f32.mrb[8].mxu0  ;;  %v1511_v37 = vpop.f32.mrb[8].mxu1 }
 0x1ae   : > { %v1472_v36 = vpop.f32.mrb[9].mxu0  ;;  %v1513_v45 = vpop.f32.mrb[9].mxu1  ;;  %v1859_v48 = vadd.f32 %v1786_v33, %v1470_v35  ;;  %v1861_v49 = vadd.f32 %v1794_v34, %v1511_v37 }
 0x1af   : > { %v1474_v46 = vpop.f32.mrb[10].mxu0  ;;  %v1515_v47 = vpop.f32.mrb[10].mxu1  ;;  %v1860_v52 = vadd.f32 %v1790_v38, %v1472_v36  ;;  %v1862_v53 = vadd.f32 %v1798_v42, %v1513_v45 }
 0x1b0   : > { %v1475_v50 = vpop.f32.mrb[11].mxu0  ;;  %v1516_v51 = vpop.f32.mrb[11].mxu1  ;;  %vm1879_vm8 = vcmp.ge.f32.partialorder %v1859_v48, 0.0  ;;  %v1899_v54 = vmul.f32 0.01, %v1859_v48  ;;  %vm1881_vm9 = vcmp.ge.f32.partialorder %v1861_v49, 0.0 }
 0x1b1   : > { %v1901_v55 = vmul.f32 0.01, %v1861_v49  ;;  %vm1880_vm10 = vcmp.ge.f32.partialorder %v1860_v52, 0.0  ;;  %v1900_v56 = vmul.f32 0.01, %v1860_v52  ;;  %vm1882_vm11 = vcmp.ge.f32.partialorder %v1862_v53, 0.0 }
 0x1b2   : > { %v1902_v57 = vmul.f32 0.01, %v1862_v53  ;;  %v1919_v58 = vsel %vm1879_vm8, %v1859_v48, %v1899_v54 }
 0x1b3   : > { %v1921_v59 = vsel %vm1881_vm9, %v1861_v49, %v1901_v55  ;;  %1939 = vst [vmem:[%s3189_s9 + $0x40] sm:$0xff] %v1919_v58  ;;  %v1920_v60 = vsel %vm1880_vm10, %v1860_v52, %v1900_v56 }
 0x1b4   : > { %1941 = vst [vmem:[%s3189_s9 + $0x50] sm:$0xff] %v1921_v59  ;;  %v1922_v61 = vsel %vm1882_vm11, %v1862_v53, %v1902_v57  ;;  %1940 = vst [vmem:[%s3189_s9 + $0x48] sm:$0xff] %v1920_v60 }
 0x1b5   : > { %1942 = vst [vmem:[%s3189_s9 + $0x58] sm:$0xff] %v1922_v61 }
 0x1cd   : > { %v1552_v1 = vpop.f32.mrb[12].mxu0  ;;  %v1593_v2 = vpop.f32.mrb[12].mxu1 }
 0x1ce   : > { %v1554_v9 = vpop.f32.mrb[13].mxu0  ;;  %v1595_v10 = vpop.f32.mrb[13].mxu1  ;;  %v1863_v13 = vadd.f32 %v1802_v62, %v1552_v1  ;;  %v1865_v14 = vadd.f32 %v1810_v63, %v1593_v2 }
 0x1cf   : > { %v1556_v11 = vpop.f32.mrb[14].mxu0  ;;  %v1597_v12 = vpop.f32.mrb[14].mxu1  ;;  %v1864_v16 = vadd.f32 %v1806_v3, %v1554_v9  ;;  %v1866_v6 = vadd.f32 %v1814_v4, %v1595_v10 }
 0x1d0   : > { %v1557_v5 = vpop.f32.mrb[15].mxu0  ;;  %v1598_v15 = vpop.f32.mrb[15].mxu1  ;;  %vm1883_vm12 = vcmp.ge.f32.partialorder %v1863_v13, 0.0  ;;  %v1903_v7 = vmul.f32 0.01, %v1863_v13  ;;  %vm1885_vm13 = vcmp.ge.f32.partialorder %v1865_v14, 0.0 }
 0x1d1   : > { %v1905_v39 = vmul.f32 0.01, %v1865_v14  ;;  %vm1884_vm14 = vcmp.ge.f32.partialorder %v1864_v16, 0.0  ;;  %v1904_v8 = vmul.f32 0.01, %v1864_v16  ;;  %vm1886_vm15 = vcmp.ge.f32.partialorder %v1866_v6, 0.0 }
 0x1d2   : > { %v1906_v17 = vmul.f32 0.01, %v1866_v6  ;;  %v1923_v18 = vsel %vm1883_vm12, %v1863_v13, %v1903_v7 }
 0x1d3   : > { %v1925_v19 = vsel %vm1885_vm13, %v1865_v14, %v1905_v39  ;;  %1943 = vst [vmem:[%s3189_s9 + $0x60] sm:$0xff] %v1923_v18  ;;  %v1924_v20 = vsel %vm1884_vm14, %v1864_v16, %v1904_v8 }
 0x1d4   : > { %1945 = vst [vmem:[%s3189_s9 + $0x70] sm:$0xff] %v1925_v19  ;;  %v1926_v21 = vsel %vm1886_vm15, %v1866_v6, %v1906_v17  ;;  %1944 = vst [vmem:[%s3189_s9 + $0x68] sm:$0xff] %v1924_v20 }
 0x1d5   : > { %1946 = vst [vmem:[%s3189_s9 + $0x78] sm:$0xff] %v1926_v21 }
 0x1ed   : > { %v1634_v24 = vpop.f32.mrb[16].mxu0  ;;  %v1675_v25 = vpop.f32.mrb[16].mxu1 }
 0x1ee   : > { %v1636_v28 = vpop.f32.mrb[17].mxu0  ;;  %v1677_v29 = vpop.f32.mrb[17].mxu1  ;;  %v1867_v32 = vadd.f32 %v1818_v22, %v1634_v24  ;;  %v1869_v33 = vadd.f32 %v1826_v23, %v1675_v25 }
 0x1ef   : > { %v1638_v30 = vpop.f32.mrb[18].mxu0  ;;  %v1679_v31 = vpop.f32.mrb[18].mxu1  ;;  %v1868_v40 = vadd.f32 %v1822_v26, %v1636_v28  ;;  %v1870_v41 = vadd.f32 %v1830_v27, %v1677_v29 }
 0x1f0   : > { %v1639_v34 = vpop.f32.mrb[19].mxu0  ;;  %v1680_v35 = vpop.f32.mrb[19].mxu1  ;;  %vm1887_vm0 = vcmp.ge.f32.partialorder %v1867_v32, 0.0  ;;  %v1907_v37 = vmul.f32 0.01, %v1867_v32  ;;  %vm1889_vm1 = vcmp.ge.f32.partialorder %v1869_v33, 0.0 }
 0x1f1   : > { %v1909_v43 = vmul.f32 0.01, %v1869_v33  ;;  %vm1888_vm2 = vcmp.ge.f32.partialorder %v1868_v40, 0.0  ;;  %v1908_v44 = vmul.f32 0.01, %v1868_v40  ;;  %vm1890_vm3 = vcmp.ge.f32.partialorder %v1870_v41, 0.0 }
 0x1f2   : > { %v1910_v38 = vmul.f32 0.01, %v1870_v41  ;;  %v1927_v42 = vsel %vm1887_vm0, %v1867_v32, %v1907_v37 }
 0x1f3   : > { %v1929_v36 = vsel %vm1889_vm1, %v1869_v33, %v1909_v43  ;;  %1947 = vst [vmem:[%s3189_s9 + $0x80] sm:$0xff] %v1927_v42  ;;  %v1928_v45 = vsel %vm1888_vm2, %v1868_v40, %v1908_v44 }
 0x1f4   : > { %1949 = vst [vmem:[%s3189_s9 + $0x90] sm:$0xff] %v1929_v36  ;;  %v1930_v46 = vsel %vm1890_vm3, %v1870_v41, %v1910_v38  ;;  %1948 = vst [vmem:[%s3189_s9 + $0x88] sm:$0xff] %v1928_v45 }
 0x1f5   : > { %1950 = vst [vmem:[%s3189_s9 + $0x98] sm:$0xff] %v1930_v46 }
 0x1f6   : > { %2685 = shalt.err (!%p2682_p2)
}
 0x1f7   : > { %s2686_s19 = scalar_lea.hbm %s3242_s6, 2560  ;;  %s2690_s29 = scalar_lea.hbm %s3297_s3, 10240 }
 0x1f8   : > { %p2687_p6 = scmp.ne.s32.totalorder %s3242_s6, %s2686_s19  ;;  %p2691_p7 = scmp.lt.u32.totalorder %s3242_s6, %s3297_s3 }
 0x1f9   : > { %p2692_p9 = scmp.lt.u32.totalorder %s2690_s29, %s2686_s19  ;;  %p2694_p12 = scmp.lt.u32.totalorder %s2686_s19, %s3242_s6 }
 0x1fa   : > { %p2688_p4 = pnand %p2687_p6, %p3322_p5 }
 0x1fb   : > { %p2693_p0 = por %p2692_p9, %p2691_p7 }
 0x1fc   : > { %p2689_p3 = pneg %p2688_p4 }
 0x1fd   : > { %p2695_p1 = por %p2694_p12, %p2693_p0 }
 0x1ff   : > { %p2696_p11 = pnand %p2695_p1, %p2689_p3 }
 0x201   : > { %2699 = shalt.err (!%p2696_p11)
}
 0x202   : > { %2269 = dma.vmem_to_hbm [thread:$0]  (%p3322_p5), %s3244_s26, 2560, %s3242_s6, %s1952_s23  }
 0x203 PF: > { %p2289_p13 = scmp.ge.s32.totalorder %s2758_s17, 2  ;;  %s1978_s5 = sand.u32 1, %s2738_s12  }
 0x204   : > { %p3323_p10 = scmp.ne.s32.totalorder %s3312_s4, 0  ;;  %s1979_s30 = scalar_lea.sflag [#allocation4], %s1978_s5 }
 0x206   : > { %p2283_p8 = pnand %p2289_p13, %p3323_p10 }
 0x208   : > { %2733 = dma.done.wait (!%p2283_p8), %s1979_s30, 2560  }
 0x209   : > { %2735 = vsyncadd (!%p2283_p8), %s1979_s30, 4294964736  ;;  %s20_s17 = sadd.s32 1, %s2758_s17   ;;  %s3324_s28 = sld [smem:[#allocation12_spill]] }
 0x20a   : > { %p17_p2 = scmp.ge.s32.totalorder %s20_s17, 6   ;;  %s3325_s12 = smov %s2742_s13 }
 0x20b   : > { %s3326_s13 = smov %s2746_s14  ;;  %s3327_s14 = smov %s2835_s24 }
 0x20c   : > { %s3328_s15 = smov %s2754_s16  ;;  %19 = sbr.rel (!%p17_p2) target bundleno = 9 (0x9), region = 102 }
 0x20f   : > { %s3329_s16 = smov %s3324_s28 }
 0x213   :  { %1984 = vsyncpa [#allocation3], 1 }
 0x214   :  { %1986 = vsyncpa [#allocation3 + $0x1], 1 }
 0x215   :  { %1987 = vsyncpa [#allocation6], 1 }
 0x216   :  { %1989 = vsyncpa [#allocation6 + $0x1], 1 }
 0x217   :  { %1990 = vsyncpa [#allocation4], 1 }
 0x218   :  { %1992 = vsyncpa [#allocation4 + $0x1], 1 }

</bundles_post_ra>
